<compile_context>
chip_gen: v6e
topology: v6e:2x2x1
jax: 0.10.0
libtpu: 0.0.40
codegen_flags: <defaults>
</compile_context>

<pallas_src>
import functools

import jax
import jax.numpy as jnp
from jax.experimental import pallas as pl
from jax.experimental.pallas import tpu as pltpu

IMG = 28 * 28          # 784 flattened pixels
MIDDLE = 100           # encoder hidden width
BOTTLENECK = 2         # z width (fused away in the kernel)
NUM_CLASSES = 10       # logits
MID_PAD = 128          # 100 -> 128 (lane-dense hidden)
OUT_PAD = 128          # fused-head compute width (store is sliced to 10)
MAX_BATCH_TILE = 2048  # rows per grid step (f32 x tile: ~6.3 MiB, x2 buffers)


def _round_up(n, m):
    return ((n + m - 1) // m) * m


def _choose_batch_tile(b):
    tb = min(MAX_BATCH_TILE, _round_up(b, 8))
    nt = -(-b // tb)
    if nt > 1 and nt % 2 == 1:
        # Prefer an even (>=2) tile count so v7x's 2 TensorCores both get work.
        nt += 1
        tb = _round_up(-(-b // nt), 8)
    return tb


def _mnist_fwd_kernel(x_ref, w1_ref, b1_ref, w23_ref, b23_ref, out_ref):
    # x arrives f32 straight from HBM; cast to bf16 in-register (no extra
    # wrapper-side HBM pass) and accumulate in f32 on the MXU.
    x = x_ref[...].astype(jnp.bfloat16)
    h = jnp.dot(x, w1_ref[...], preferred_element_type=jnp.float32)
    h = jax.nn.sigmoid(h + b1_ref[...])                      # EUP exp, f32
    # Fused bottleneck + classification head: (TB, 128) @ (128, 128).
    logits = jnp.dot(h.astype(jnp.bfloat16), w23_ref[...],
                     preferred_element_type=jnp.float32)
    logits = logits + b23_ref[...]
    # Only the first NUM_CLASSES lanes are meaningful; store just those.
    # (Masked vst -- stores are nowhere near the binding slot here.)
    out_ref[...] = logits[:, :NUM_CLASSES].astype(out_ref.dtype)


def make_fused_params(params):
    """Fuse layers 2+3, pad to lane-dense shapes, cast weights to bf16.

    Call ONCE per set of weights and reuse the result across forward calls
    (it is ~230 KiB of constants; recomputing it per call costs as much as
    the kernel for small batches).
    """
    w1, b1, w2, b2, w3, b3 = params
    w1 = w1.astype(jnp.float32)
    b1 = b1.reshape(1, MIDDLE).astype(jnp.float32)
    w2 = w2.astype(jnp.float32)
    b2 = b2.reshape(1, BOTTLENECK).astype(jnp.float32)
    w3 = w3.astype(jnp.float32)
    b3 = b3.reshape(1, NUM_CLASSES).astype(jnp.float32)

    # No nonlinearity between layers 2 and 3 -> fold them into one matmul.
    w23 = w2 @ w3                      # (100, 10)
    b23 = b2 @ w3 + b3                 # (1, 10)

    w1_p = jnp.zeros((IMG, MID_PAD), jnp.float32).at[:, :MIDDLE].set(w1)
    b1_p = jnp.zeros((1, MID_PAD), jnp.float32).at[:, :MIDDLE].set(b1)
    w23_p = jnp.zeros((MID_PAD, OUT_PAD), jnp.float32)
    w23_p = w23_p.at[:MIDDLE, :NUM_CLASSES].set(w23)
    b23_p = jnp.zeros((1, OUT_PAD), jnp.float32).at[:, :NUM_CLASSES].set(b23)
    return (w1_p.astype(jnp.bfloat16), b1_p,
            w23_p.astype(jnp.bfloat16), b23_p)


@functools.partial(jax.jit, static_argnames=("batch_tile",))
def mnist_autoencoder_forward(x_nchw, fused_params, *, batch_tile=None):
    """Forward pass. x_nchw: (B, 1, 28, 28) f32 -> logits (B, 10) float32."""
    w1_p, b1_p, w23_p, b23_p = fused_params
    b = x_nchw.shape[0]
    x_flat = x_nchw.reshape(b, IMG)    # torch.flatten(x, 1); stays f32

    tb = _choose_batch_tile(b) if batch_tile is None else batch_tile
    assert tb % 8 == 0, "batch tile must be a multiple of 8 for f32 inputs"
    num_tiles = pl.cdiv(b, tb)
    b_pad = num_tiles * tb
    if b_pad != b:                     # pad only when the batch doesn't divide
        x_flat = jnp.pad(x_flat, ((0, b_pad - b), (0, 0)))

    cost = pl.CostEstimate(
        flops=2 * b_pad * (IMG * MID_PAD + MID_PAD * OUT_PAD),
        transcendentals=b_pad * MID_PAD,
        bytes_accessed=(b_pad * IMG * 4                        # x (f32)
                        + IMG * MID_PAD * 2 + MID_PAD * 4      # W1, b1
                        + MID_PAD * OUT_PAD * 2 + OUT_PAD * 4  # W23, b23
                        + b_pad * NUM_CLASSES * 4),            # logits
    )

    out = pl.pallas_call(
        _mnist_fwd_kernel,
        out_shape=jax.ShapeDtypeStruct((b_pad, NUM_CLASSES), jnp.float32),
        grid=(num_tiles,),
        in_specs=[
            pl.BlockSpec((tb, IMG), lambda i: (i, 0)),           # x: streamed
            pl.BlockSpec((IMG, MID_PAD), lambda i: (0, 0)),      # W1: resident
            pl.BlockSpec((1, MID_PAD), lambda i: (0, 0)),        # b1: resident
            pl.BlockSpec((MID_PAD, OUT_PAD), lambda i: (0, 0)),  # W23: resident
            pl.BlockSpec((1, OUT_PAD), lambda i: (0, 0)),        # b23: resident
        ],
        # Last dim (10) equals the full array dim, so the (8,128) rule holds.
        out_specs=pl.BlockSpec((tb, NUM_CLASSES), lambda i: (i, 0)),
        compiler_params=pltpu.CompilerParams(
            dimension_semantics=("parallel",),     # shard batch across TCs
            vmem_limit_bytes=40 * 1024 * 1024,     # 2x f32 x-tile @ tb=2048
        ),
        cost_estimate=cost,
    )(x_flat, w1_p, b1_p, w23_p, b23_p)

    return out[:b] if b_pad != b else out


def init_params(key):
    """Deterministic synthetic init (shapes match the nn.Linear layers)."""
    k1, k2, k3, k4, k5, k6 = jax.random.split(key, 6)
    # (in, out) layout; biases kept 2D (1, out).
    w1 = jax.random.normal(k1, (IMG, MIDDLE), jnp.float32) * 0.05
    b1 = jax.random.normal(k2, (1, MIDDLE), jnp.float32) * 0.05
    w2 = jax.random.normal(k3, (MIDDLE, BOTTLENECK), jnp.float32) * 0.05
    b2 = jax.random.normal(k4, (1, BOTTLENECK), jnp.float32) * 0.05
    w3 = jax.random.normal(k5, (BOTTLENECK, NUM_CLASSES), jnp.float32) * 0.05
    b3 = jax.random.normal(k6, (1, NUM_CLASSES), jnp.float32) * 0.05
    return (w1, b1, w2, b2, w3, b3)


def _reference_forward(x_nchw, params):
    """Pure-JAX f32 reference of the original (unfused) PyTorch forward."""
    w1, b1, w2, b2, w3, b3 = params
    x = x_nchw.reshape(x_nchw.shape[0], -1)
    h = jax.nn.sigmoid(x @ w1 + b1)
    z = h @ w2 + b2
    return z @ w3 + b3


# TODO(synk): decoder / forward_autoencoder path and the BlobLayer / MothLayer
# variants are not exercised by forward() under default args, so they are not
# implemented here.

if __name__ == "__main__":
    key = jax.random.PRNGKey(0)
    kx, kp, kx2 = jax.random.split(key, 3)
    params = init_params(kp)
    fused = make_fused_params(params)   # hoisted: compute once, reuse per call

    # Small primary case (B=2, NCHW like PyTorch). Exercises batch padding
    # (2 -> 8 rows) and the sliced 10-wide output store.
    B = 2
    x = jax.random.normal(kx, (B, 1, 28, 28), jnp.float32)
    logits = jax.block_until_ready(mnist_autoencoder_forward(x, fused))
    ref = _reference_forward(x, params)
    assert logits.shape == (B, NUM_CLASSES)
    assert jnp.allclose(logits, ref, atol=1e-2, rtol=1e-2)

    # Multi-tile case: exercises the batch grid (grid=(3,)) and batch padding.
    B2 = 40
    x2 = jax.random.normal(kx2, (B2, 1, 28, 28), jnp.float32)
    logits2 = jax.block_until_ready(
        mnist_autoencoder_forward(x2, fused, batch_tile=16))
    ref2 = _reference_forward(x2, params)
    assert logits2.shape == (B2, NUM_CLASSES)
    assert jnp.allclose(logits2, ref2, atol=1e-2, rtol=1e-2)

    print("KERNEL_OK")
</pallas_src>

<mosaic_0001>
module attributes {stable_mosaic.version = 11 : i64} {
  func.func @_mnist_fwd_kernel(%arg0: i32, %arg1: memref<8x784xf32, #tpu.memory_space<vmem>>, %arg2: memref<784x128xbf16, #tpu.memory_space<vmem>>, %arg3: memref<1x128xf32, #tpu.memory_space<vmem>>, %arg4: memref<128x128xbf16, #tpu.memory_space<vmem>>, %arg5: memref<1x128xf32, #tpu.memory_space<vmem>>, %arg6: memref<8x10xf32, #tpu.memory_space<vmem>>) attributes {dimension_semantics = [#tpu.dimension_semantics<parallel>], iteration_bounds = array<i64: 1>, scalar_prefetch = 0 : i64, scratch_operands = 0 : i64, tpu.core_type = #tpu.core_type<tc>, window_params = [{transform_indices = @transform_0, window_bounds = array<i64: 8, 784>}, {pipeline_mode = #tpu.pipeline_mode<synchronous>, transform_indices = @transform_1, window_bounds = array<i64: 784, 128>}, {pipeline_mode = #tpu.pipeline_mode<synchronous>, transform_indices = @transform_2, window_bounds = array<i64: 1, 128>}, {pipeline_mode = #tpu.pipeline_mode<synchronous>, transform_indices = @transform_3, window_bounds = array<i64: 128, 128>}, {pipeline_mode = #tpu.pipeline_mode<synchronous>, transform_indices = @transform_4, window_bounds = array<i64: 1, 128>}, {transform_indices = @transform_5, window_bounds = array<i64: 8, 10>}]} {
    %c0 = arith.constant 0 : index
    %c0_0 = arith.constant 0 : index
    %0 = vector.load %arg1[%c0, %c0_0] : memref<8x784xf32, #tpu.memory_space<vmem>>, vector<8x784xf32>
    %1 = arith.truncf %0 : vector<8x784xf32> to vector<8x784xbf16>
    %c0_1 = arith.constant 0 : index
    %c0_2 = arith.constant 0 : index
    %2 = vector.load %arg2[%c0_1, %c0_2] : memref<784x128xbf16, #tpu.memory_space<vmem>>, vector<784x128xbf16>
    %cst = arith.constant dense<0.000000e+00> : vector<8x128xf32>
    %3 = tpu.matmul %1, %2, %cst {dimension_numbers = #tpu.dot_dimension_numbers<[1], [0], [0], [1], [0, 0, 1, 1], [], []>} : vector<8x784xbf16>, vector<784x128xbf16>, vector<8x128xf32> -> vector<8x128xf32>
    %c0_3 = arith.constant 0 : index
    %c0_4 = arith.constant 0 : index
    %4 = vector.load %arg3[%c0_3, %c0_4] : memref<1x128xf32, #tpu.memory_space<vmem>>, vector<1x128xf32>
    %5 = vector.broadcast %4 : vector<1x128xf32> to vector<8x128xf32>
    %6 = arith.addf %3, %5 : vector<8x128xf32>
    %7 = arith.negf %6 : vector<8x128xf32>
    %8 = math.exp %7 : vector<8x128xf32>
    %cst_5 = arith.constant 1.000000e+00 : f32
    %9 = vector.broadcast %cst_5 : f32 to vector<8x128xf32>
    %10 = arith.addf %9, %8 : vector<8x128xf32>
    %11 = arith.divf %9, %10 : vector<8x128xf32>
    %12 = arith.truncf %11 : vector<8x128xf32> to vector<8x128xbf16>
    %c0_6 = arith.constant 0 : index
    %c0_7 = arith.constant 0 : index
    %13 = vector.load %arg4[%c0_6, %c0_7] : memref<128x128xbf16, #tpu.memory_space<vmem>>, vector<128x128xbf16>
    %cst_8 = arith.constant dense<0.000000e+00> : vector<8x128xf32>
    %14 = tpu.matmul %12, %13, %cst_8 {dimension_numbers = #tpu.dot_dimension_numbers<[1], [0], [0], [1], [0, 0, 1, 1], [], []>} : vector<8x128xbf16>, vector<128x128xbf16>, vector<8x128xf32> -> vector<8x128xf32>
    %c0_9 = arith.constant 0 : index
    %c0_10 = arith.constant 0 : index
    %15 = vector.load %arg5[%c0_9, %c0_10] : memref<1x128xf32, #tpu.memory_space<vmem>>, vector<1x128xf32>
    %16 = vector.broadcast %15 : vector<1x128xf32> to vector<8x128xf32>
    %17 = arith.addf %14, %16 : vector<8x128xf32>
    %18 = vector.extract_strided_slice %17 {offsets = [0, 0], sizes = [8, 10], strides = [1, 1]} : vector<8x128xf32> to vector<8x10xf32>
    %c0_11 = arith.constant 0 : index
    %c0_12 = arith.constant 0 : index
    %19 = vector.load %arg6[%c0_11, %c0_12] : memref<8x10xf32, #tpu.memory_space<vmem>>, vector<8x10xf32>
    tpu.vector_store %arg6[%c0_11, %c0_12], %18 {strides = array<i32>} : memref<8x10xf32, #tpu.memory_space<vmem>>, vector<8x10xf32>,
    return
  }
  func.func @transform_0(%arg0: i32) -> (i32, i32) {
    %c0_i32 = arith.constant 0 : i32
    %c0_i32_0 = arith.constant 0 : i32
    return %arg0, %c0_i32 : i32, i32
  }
  func.func @transform_1(%arg0: i32) -> (i32, i32) {
    %c0_i32 = arith.constant 0 : i32
    %c0_i32_0 = arith.constant 0 : i32
    %c0_i32_1 = arith.constant 0 : i32
    return %c0_i32, %c0_i32_0 : i32, i32
  }
  func.func @transform_2(%arg0: i32) -> (i32, i32) {
    %c0_i32 = arith.constant 0 : i32
    %c0_i32_0 = arith.constant 0 : i32
    %c0_i32_1 = arith.constant 0 : i32
    return %c0_i32, %c0_i32_0 : i32, i32
  }
  func.func @transform_3(%arg0: i32) -> (i32, i32) {
    %c0_i32 = arith.constant 0 : i32
    %c0_i32_0 = arith.constant 0 : i32
    %c0_i32_1 = arith.constant 0 : i32
    return %c0_i32, %c0_i32_0 : i32, i32
  }
  func.func @transform_4(%arg0: i32) -> (i32, i32) {
    %c0_i32 = arith.constant 0 : i32
    %c0_i32_0 = arith.constant 0 : i32
    %c0_i32_1 = arith.constant 0 : i32
    return %c0_i32, %c0_i32_0 : i32, i32
  }
  func.func @transform_5(%arg0: i32) -> (i32, i32) {
    %c0_i32 = arith.constant 0 : i32
    %c0_i32_0 = arith.constant 0 : i32
    return %arg0, %c0_i32 : i32, i32
  }
}

</mosaic_0001>

<bundles_post_ra>
// kernel: mnist_autoencoder_forward.1
= control target key start
LH: loop header
LB: loop body
LE: loop exit
PB: predicated region body
PF: predicated region fallthrough
CT: control target
= control target key end

     0   :  { %10 = vsyncpa [#allocation3], 0  ;;  %s989_s18 = smov [#allocation2]   ;;  %s1094_s0 = inlined_call_operand.vmem [shape: f32[8,784], index: 0, kind: input, shape index: {}]   ;;  %s1095_s1 = inlined_call_operand.hbm [shape: bf16[784,128], index: 1, kind: input, shape index: {}]   ;;  %s1096_s2 = inlined_call_operand.vmem [shape: f32[1,128], index: 2, kind: input, shape index: {}]   ;;  %s1097_s3 = inlined_call_operand.vmem [shape: bf16[128,128], index: 3, kind: input, shape index: {}]   ;;  %s1098_s4 = inlined_call_operand.vmem [shape: f32[1,128], index: 4, kind: input, shape index: {}]   ;;  %s1099_s5 = inlined_call_operand.vmem [shape: f32[8,10], index: 5, kind: output, shape index: {}]  }
   0x1   :  { %s18_s19 = sshll.u32 %s989_s18, 4  ;;  %s19_s19 = int_to_ptr.vmem [resolvable:$true] %s18_s19 }
   0x2   :  { %s975_s20 = scalar_lea.vmem %s19_s19, 6272  ;;  %p980_p1 = scmp.lt.s32.totalorder %s19_s19, %s19_s19 }
   0x3   :  { %p976_p0 = scmp.ne.s32.totalorder %s19_s19, %s975_s20  ;;  %p981_p2 = scmp.lt.s32.totalorder %s975_s20, %s975_s20 }
   0x5   :  { %p982_p3 = por %p981_p2, %p980_p1 }
   0x7   :  { %p983_p4 = pnand %p982_p3, %p976_p0 }
   0x9   :  { %986 = shalt.err (!%p983_p4)
}
   0xa   :  { %s990_s21 = smov 64   ;;  %s991_s22 = smov 4  }
   0xb   :  { %24 = dma.hbm_to_vmem [thread:$0]  %s1095_s1, 6272, %s19_s19, [#allocation3], %s990_s21, %s990_s21, %s991_s22  }
   0xc   :  { %987 = dma.done.wait [#allocation3], 6272  }
   0xd   :  { %988 = vsyncadd [#allocation3], 4294961024  ;;  %v906_v0 = vld [vmem:[#allocation2 + $0x78] sm:$0xff]   ;;  %v910_v4 = vld [vmem:[#allocation2 + $0x70] sm:$0xff]   ;;  %v992_v44 = vmov 0.0   ;;  %vm993_vm0 = vmmov 0  }
   0xe   :  { %v907_v1 = vld [vmem:[#allocation2 + $0x38] sm:$0xff]   ;;  %798 = vmatprep.subr.bf16.mxu0 %v906_v0  ;;  %v911_v5 = vld [vmem:[#allocation2 + $0x30] sm:$0xff]   ;;  %v914_v8 = vld [vmem:[#allocation2 + $0x68] sm:$0xff]   ;;  %vm448_vm1 = vcmask 130048   ;;  %vm730_vm2 = vcmask 80896  }
   0xf   :  { %v908_v2 = vld [vmem:[#allocation2 + $0xf8] sm:$0xff]   ;;  %799 = vmatpush3.bf16.msra.mxu0 %v907_v1  ;;  %v912_v6 = vld [vmem:[#allocation2 + $0xf0] sm:$0xff]   ;;  %v915_v9 = vld [vmem:[#allocation2 + $0x28] sm:$0xff]  }
  0x10   :  { %v909_v3 = vld [vmem:[#allocation2 + $0xb8] sm:$0xff]   ;;  %820 = vmatprep.subr.bf16.mxu1 %v908_v2  ;;  %800 = vmatprep.subr.bf16.mxu0 %v910_v4  ;;  %v913_v7 = vld [vmem:[#allocation2 + $0xb0] sm:$0xff]   ;;  %v916_v10 = vld [vmem:[#allocation2 + $0xe8] sm:$0xff]  }
  0x11   :  { %821 = vmatpush3.bf16.msra.mxu1 %v909_v3  ;;  %v917_v11 = vld [vmem:[#allocation2 + $0xa8] sm:$0xff]   ;;  %v918_v12 = vld [vmem:[#allocation2 + $0x60] sm:$0xff]   ;;  %v922_v16 = vld [vmem:[#allocation2 + $0x58] sm:$0xff]  }
  0x12   :  { %822 = vmatprep.subr.bf16.mxu1 %v912_v6  ;;  %v919_v13 = vld [vmem:[#allocation2 + $0x20] sm:$0xff]   ;;  %v923_v17 = vld [vmem:[#allocation2 + $0x18] sm:$0xff]   ;;  %v926_v20 = vld [vmem:[#allocation2 + $0x50] sm:$0xff]  }
  0x13   :  { %801 = vmatpush3.bf16.msra.mxu0 %v911_v5  ;;  %v920_v14 = vld [vmem:[#allocation2 + $0xe0] sm:$0xff]   ;;  %v924_v18 = vld [vmem:[#allocation2 + $0xd8] sm:$0xff]   ;;  %v927_v21 = vld [vmem:[#allocation2 + $0x10] sm:$0xff]  }
  0x14   :  { %802 = vmatprep.subr.bf16.mxu0 %v914_v8  ;;  %v921_v15 = vld [vmem:[#allocation2 + $0xa0] sm:$0xff]   ;;  %v925_v19 = vld [vmem:[#allocation2 + $0x98] sm:$0xff]   ;;  %v928_v22 = vld [vmem:[#allocation2 + $0xd0] sm:$0xff]  }
  0x15   :  { %823 = vmatpush3.bf16.msra.mxu1 %v913_v7  ;;  %v929_v23 = vld [vmem:[#allocation2 + $0x90] sm:$0xff]   ;;  %v930_v24 = vld [vmem:[#allocation2 + $0x48] sm:$0xff]   ;;  %v934_v28 = vld [vmem:[#allocation2 + $0x40] sm:$0xff]  }
  0x16   :  { %824 = vmatprep.subr.bf16.mxu1 %v916_v10  ;;  %v931_v25 = vld [vmem:[#allocation2 + $0x8] sm:$0xff]   ;;  %v935_v29 = vld [vmem:[#allocation2] sm:$0xff]   ;;  %v938_v36 = vld [vmem:[#allocation2 + $0x178] sm:$0xff]  }
  0x17   :  { %803 = vmatpush3.bf16.msra.mxu0 %v915_v9  ;;  %v932_v26 = vld [vmem:[#allocation2 + $0xc8] sm:$0xff]   ;;  %v936_v30 = vld [vmem:[#allocation2 + $0xc0] sm:$0xff]   ;;  %v38_v37 = vld [vmem:[%s1094_s0 + $0x18] sm:$0xff] }
  0x18   :  { %804 = vmatprep.subr.bf16.mxu0 %v918_v12  ;;  %v933_v27 = vld [vmem:[#allocation2 + $0x88] sm:$0xff]   ;;  %v937_v33 = vld [vmem:[#allocation2 + $0x80] sm:$0xff]   ;;  %v45_v38 = vpack.c.bf16 %v38_v37, %v38_v37  ;;  %v939_v39 = vld [vmem:[#allocation2 + $0x138] sm:$0xff]  }
  0x19   :  { %825 = vmatpush3.bf16.msra.mxu1 %v917_v11  ;;  %v36_v31 = vld [vmem:[%s1094_s0 + $0x8] sm:$0xff]  ;;  %v35_v34 = vld [vmem:[%s1094_s0] sm:$0xff]  ;;  %v37_v40 = vld [vmem:[%s1094_s0 + $0x10] sm:$0xff] }
  0x1a   :  { %826 = vmatprep.subr.bf16.mxu1 %v920_v14  ;;  %v43_v32 = vpack.c.bf16 %v36_v31, %v36_v31  ;;  %v42_v35 = vpack.c.bf16 %v35_v34, %v35_v34  ;;  %524 = vmatprep.mubr.bf16.mxu1 %v45_v38  ;;  %v44_v41 = vpack.c.bf16 %v37_v40, %v37_v40  ;;  %v940_v42 = vld [vmem:[#allocation2 + $0x170] sm:$0xff]   ;;  %v942_v45 = vld [vmem:[#allocation2 + $0x168] sm:$0xff]   ;;  %v944_v47 = vld [vmem:[#allocation2 + $0x160] sm:$0xff]  }
  0x1b   :  { %805 = vmatpush3.bf16.msra.mxu0 %v919_v13  ;;  %v941_v43 = vld [vmem:[#allocation2 + $0x130] sm:$0xff]   ;;  %v943_v46 = vld [vmem:[#allocation2 + $0x128] sm:$0xff]   ;;  %v945_v48 = vld [vmem:[#allocation2 + $0x120] sm:$0xff]  }
  0x1c   :  { %806 = vmatprep.subr.bf16.mxu0 %v922_v16  ;;  %484 = vmatprep.mubr.bf16.mxu0 %v43_v32  ;;  %v946_v49 = vld [vmem:[#allocation2 + $0x158] sm:$0xff]   ;;  %v948_v51 = vld [vmem:[#allocation2 + $0x150] sm:$0xff]   ;;  %v954_v53 = vld [vmem:[#allocation2 + $0x180] sm:$0xff]  }
  0x1d   :  { %827 = vmatpush3.bf16.msra.mxu1 %v921_v15  ;;  %v947_v50 = vld [vmem:[#allocation2 + $0x118] sm:$0xff]   ;;  %v949_v52 = vld [vmem:[#allocation2 + $0x110] sm:$0xff]   ;;  %v40_v54 = vld [vmem:[%s1094_s0 + $0x28] sm:$0xff] }
  0x1e   :  { %828 = vmatprep.subr.bf16.mxu1 %v924_v18  ;;  %v950_v55 = vld [vmem:[#allocation2 + $0x148] sm:$0xff]   ;;  %v47_v56 = vpack.c.bf16 %v40_v54, %v40_v54  ;;  %v41_v57 = vld [vmem:[%s1094_s0 + $0x30] sm:$0xff]  ;;  %v952_v60 = vld [vmem:[#allocation2 + $0x140] sm:$0xff]  }
  0x1f   :  { %807 = vmatpush3.bf16.msra.mxu0 %v923_v17  ;;  %v48_v58 = vpack.c.bf16 %v41_v57, %v41_v57  ;;  %v951_v59 = vld [vmem:[#allocation2 + $0x108] sm:$0xff]   ;;  %v953_v61 = vld [vmem:[#allocation2 + $0x100] sm:$0xff]   ;;  %v955_v0 = vld [vmem:[%s1097_s3 + $0x38] sm:$0xff]  }
  0x20   :  { %808 = vmatprep.subr.bf16.mxu0 %v926_v20  ;;  %v39_v62 = vld [vmem:[%s1094_s0 + $0x20] sm:$0xff]  ;;  %v956_v1 = vld [vmem:[%s1097_s3 + $0x30] sm:$0xff]   ;;  %v957_v2 = vld [vmem:[%s1097_s3 + $0x28] sm:$0xff]  }
  0x21   :  { %829 = vmatpush3.bf16.msra.mxu1 %v925_v19  ;;  %v46_v63 = vpack.c.bf16 %v39_v62, %v39_v62  ;;  %v958_v3 = vld [vmem:[%s1097_s3 + $0x20] sm:$0xff]   ;;  %v959_v4 = vld [vmem:[%s1097_s3 + $0x18] sm:$0xff]   ;;  %v960_v5 = vld [vmem:[%s1097_s3 + $0x10] sm:$0xff]  }
  0x22   :  { %830 = vmatprep.subr.bf16.mxu1 %v928_v22  ;;  %v961_v6 = vld [vmem:[%s1097_s3 + $0x8] sm:$0xff]   ;;  %v962_v7 = vld [vmem:[%s1097_s3] sm:$0xff]  }
  0x23   :  { %809 = vmatpush3.bf16.msra.mxu0 %v927_v21  ;;  %v737_v21 = vld [vmem:[%s1096_s2] ss:$0 sm:$0xff] }
  0x24   :  { %810 = vmatprep.subr.bf16.mxu0 %v930_v24  ;;  %v789_v37 = vld [vmem:[%s1098_s4] ss:$0 sm:$0xff] }
  0x25   :  { %831 = vmatpush3.bf16.msra.mxu1 %v929_v23 }
  0x26   :  { %832 = vmatprep.subr.bf16.mxu1 %v932_v26 }
  0x27   :  { %811 = vmatpush3.bf16.msra.mxu0 %v931_v25 }
  0x28   :  { %812 = vmatprep.subr.bf16.mxu0 %v934_v28 }
  0x29   :  { %833 = vmatpush3.bf16.msra.mxu1 %v933_v27 }
  0x2a   :  { %834 = vmatprep.subr.bf16.mxu1 %v936_v30 }
  0x2b   :  { %813 = vmatpush3.bf16.msra.mxu0 %v935_v29 }
  0x2c   :  { %842 = vmatprep.subr.bf16.mxu0 %v938_v36 }
  0x2d   :  { %835 = vmatpush3.bf16.msra.mxu1 %v937_v33 }
  0x2e   :  { %485 = vmatmul.mubr.bf16.vlgmr.msra.gmra.mxu0 %v42_v35  ;;  %875 = vmatprep.subr.bf16.mxu1 %v992_v44 }
  0x2f   :  { %843 = vmatpush3.bf16.msra.mxu0 %v939_v39  ;;  %564 = vmatprep.mubr.bf16.mxu0 %v47_v56 }
  0x30   :  { %525 = vmatmul.mubr.bf16.vlgmr.msra.gmra.mxu1 %v44_v41  ;;  %844 = vmatprep.subr.bf16.mxu0 %v940_v42 }
  0x31   :  { %877 = vmatprep.mubr.msk.bf16.mxu1 %vm993_vm0, %v992_v44  ;;  %876 = vmatpush3.bf16.msra.mxu1 %v954_v53 }
  0x32   :  { %881 = vmatprep.subr.bf16.mxu1 %v992_v44 }
  0x33   :  { %845 = vmatpush3.bf16.msra.mxu0 %v941_v43 }
  0x34   :  { %846 = vmatprep.subr.bf16.mxu0 %v942_v45 }
  0x37   :  { %847 = vmatpush3.bf16.msra.mxu0 %v943_v46 }
  0x38   :  { %848 = vmatprep.subr.bf16.mxu0 %v944_v47  ;;  %878 = vmatmul.mubr.msk.bf16.vlgmr.msra.gmra.mxu1 %vm448_vm1, %v48_v58 }
  0x39   :  { %897 = vmatprep.mubr.msk.bf16.mxu1 %vm993_vm0, %v992_v44  ;;  %882 = vmatpush3.bf16.msra.mxu1 %v955_v0 }
  0x3a   :  { %883 = vmatprep.subr.bf16.mxu1 %v992_v44 }
  0x3b   :  { %849 = vmatpush3.bf16.msra.mxu0 %v945_v48 }
  0x3c   :  { %850 = vmatprep.subr.bf16.mxu0 %v946_v49 }
  0x3d   :  { %884 = vmatpush3.bf16.msra.mxu1 %v956_v1 }
  0x3e   :  { %885 = vmatprep.subr.bf16.mxu1 %v992_v44 }
  0x3f   :  { %851 = vmatpush3.bf16.msra.mxu0 %v947_v50 }
  0x40   :  { %852 = vmatprep.subr.bf16.mxu0 %v948_v51 }
  0x41   :  { %886 = vmatpush3.bf16.msra.mxu1 %v957_v2 }
  0x42   :  { %887 = vmatprep.subr.bf16.mxu1 %v992_v44 }
  0x43   :  { %853 = vmatpush3.bf16.msra.mxu0 %v949_v52 }
  0x44   :  { %854 = vmatprep.subr.bf16.mxu0 %v950_v55 }
  0x45   :  { %888 = vmatpush3.bf16.msra.mxu1 %v958_v3 }
  0x46   :  { %889 = vmatprep.subr.bf16.mxu1 %v992_v44 }
  0x47   :  { %855 = vmatpush3.bf16.msra.mxu0 %v951_v59 }
  0x48   :  { %856 = vmatprep.subr.bf16.mxu0 %v952_v60 }
  0x49   :  { %890 = vmatpush3.bf16.msra.mxu1 %v959_v4 }
  0x4a   :  { %891 = vmatprep.subr.bf16.mxu1 %v992_v44 }
  0x4b   :  { %857 = vmatpush3.bf16.msra.mxu0 %v953_v61 }
  0x4d   :  { %892 = vmatpush3.bf16.msra.mxu1 %v960_v5 }
  0x4e   :  { %565 = vmatmul.mubr.bf16.vlgmr.msra.gmra.mxu0 %v46_v63  ;;  %893 = vmatprep.subr.bf16.mxu1 %v992_v44 }
  0x51   :  { %894 = vmatpush3.bf16.msra.mxu1 %v961_v6 }
  0x52   :  { %895 = vmatprep.subr.bf16.mxu1 %v992_v44 }
  0x55   :  { %896 = vmatpush3.bf16.msra.mxu1 %v962_v7 }
  0xee   :  { %v814_v8 = vpop.f32.mrf.mxu0 }
  0xf0   :  { %v815_v9 = vpop.f32.mrf.mxu0  ;;  %v836_v10 = vpop.f32.mrf.mxu1 }
  0xf1   :  { %v816_v20 = vadd.f32 %v815_v9, %v814_v8 }
  0xf2   :  { %v817_v11 = vpop.f32.mrf.mxu0  ;;  %v837_v12 = vpop.f32.mrf.mxu1 }
  0xf3   :  { %v487_v22 = vadd.f32 %v816_v20, %v737_v21  ;;  %v838_v23 = vadd.f32 %v837_v12, %v836_v10 }
  0xf4   :  { %v818_v13 = vpop.f32.mrf.mxu0  ;;  %v839_v14 = vpop.f32.mrf.mxu1 }
  0xf5   :  { %v527_v26 = vadd.f32 %v838_v23, %v487_v22 }
  0xf6   :  { %v840_v15 = vpop.f32.mrf.mxu1 }
  0xf8   :  { %v606_v16 = vpop.f32.mrf.mxu1 }
  0xfa   :  { %v879_v17 = vpop.f32.mrf.mxu1 }
  0xfc   :  { %v609_v18 = vpop.f32.mrf.mxu1 }
  0xfe   :  { %v880_v19 = vpop.f32.mrf.mxu1 }
 0x10e   :  { %v858_v24 = vpop.f32.mrf.mxu0 }
 0x110   :  { %v859_v25 = vpop.f32.mrf.mxu0 }
 0x111   :  { %v860_v27 = vadd.f32 %v859_v25, %v858_v24 }
 0x112   :  { %v861_v28 = vpop.f32.mrf.mxu0 }
 0x113   :  { %v567_v29 = vadd.f32 %v860_v27, %v527_v26 }
 0x114   :  { %v862_v30 = vpop.f32.mrf.mxu0 }
 0x115   :  { %v607_v31 = vadd.f32 %v606_v16, %v567_v29 }
 0x117   :  { %v788_v32 = vmul.f32 -1.442695, %v607_v31 }
 0x119   :  { %963 = vpow2.f32 %v788_v32 }
 0x126   :  { %v964_v33 = vpop.eup %963 }
 0x127   :  { %v615_v34 = vadd.f32 1.0, %v964_v33 }
 0x129   :  { %965 = vrcp.f32 %v615_v34 }
 0x136   :  { %v966_v35 = vpop.eup %965 }
 0x137   :  { %v618_v36 = vpack.c.bf16 %v966_v35, %v966_v35 }
 0x139   :  { %898 = vmatmul.mubr.bf16.vlgmr.msra.gmra.mxu1 %v618_v36 }
 0x1f9   :  { %v724_v38 = vpop.f32.mrf.mxu1 }
 0x1fa   :  { %v725_v39 = vadd.f32 %v789_v37, %v724_v38 }
 0x1fb   :  { %v899_v40 = vpop.f32.mrf.mxu1 }
 0x1fc   :  { %731 = vst.msk [vmem:[%s1099_s5] sm:$0xff] %vm730_vm2, %v725_v39 }
 0x1fd   :  { %v727_v41 = vpop.f32.mrf.mxu1 }
 0x1ff   :  { %v900_v42 = vpop.f32.mrf.mxu1 }
 0x200   :  { %736 = vsyncpa [#allocation3], 1 }

</bundles_post_ra>
